<compile_context>
chip_gen: v7x
topology: tpu7x:2x2x1
jax: 0.10.0
libtpu: 0.0.40
codegen_flags: <defaults>
</compile_context>

<pallas_src>
import functools
import math

import jax
import jax.numpy as jnp
from jax.experimental import pallas as pl
from jax.experimental.pallas import tpu as pltpu

_LANE = 128


def _masked_mse_partial_kernel(x_ref, t_ref, o_ref, *, ignore_index, tile_rows,
                               valid_rows, ragged):
    t_raw = t_ref[...]                                    # native dtype
    # Compare in the target's native dtype (matches PyTorch .ne_(ignore_index)).
    keep = t_raw != jnp.asarray(ignore_index, dtype=t_raw.dtype)

    if ragged:
        # Last grid tile extends past the array: mask garbage rows by global
        # row index.  Compiled only when rows % tile_rows != 0.
        row0 = pl.program_id(0) * tile_rows
        ridx = jax.lax.broadcasted_iota(jnp.int32, t_raw.shape, 0) + row0
        keep = jnp.logical_and(keep, ridx < valid_rows)

    x = x_ref[...].astype(jnp.float32)
    t = t_raw.astype(jnp.float32)
    # where(mask, x - t, 0) == (x*mask - t*mask); single select, no mask mults.
    d = jnp.where(keep, x - t, jnp.float32(0.0))
    sq = d * d                                            # (tile_rows, 128)
    # Sublane-aligned reshape + leading-axis sum = pure VPU adds (no XLU).
    o_ref[...] = jnp.sum(sq.reshape(-1, 8, _LANE), axis=0)      # (8, 128)


def masked_mse_loss(inp, target, ignore_index, *, max_tile_rows=4096):
    """mean((input*mask - target*mask)**2) with mask = (target != ignore_index)."""
    assert inp.shape == target.shape, (inp.shape, target.shape)
    total = math.prod(inp.shape)

    def _pack(dt):
        return max(1, 4 // jnp.dtype(dt).itemsize)

    # Sublane multiple for the packed dtype: 8 (f32), 16 (bf16), 32 (int8/fp8).
    sub = 8 * max(_pack(inp.dtype), _pack(target.dtype))

    # Pad only to the minimal (sub, 128) slab boundary -- NOT the tile boundary.
    # Pad values are zeros and contribute exactly 0 to the masked sum.
    slab = sub * _LANE
    pad_total = -(-total // slab) * slab
    rows = pad_total // _LANE                       # multiple of `sub`

    x = jnp.reshape(inp, (-1,))
    t = jnp.reshape(target, (-1,))
    if pad_total != total:
        x = jnp.pad(x, (0, pad_total - total))
        t = jnp.pad(t, (0, pad_total - total))
    x = jnp.reshape(x, (rows, _LANE))
    t = jnp.reshape(t, (rows, _LANE))

    max_tile_rows = max(sub, (max_tile_rows // sub) * sub)
    tile_rows = min(max_tile_rows, rows)            # multiple of `sub`
    num_tiles = -(-rows // tile_rows)               # cdiv; last tile may be ragged
    ragged = (rows % tile_rows) != 0

    kernel = functools.partial(
        _masked_mse_partial_kernel,
        ignore_index=float(ignore_index),
        tile_rows=tile_rows,
        valid_rows=rows,
        ragged=ragged,
    )

    bytes_in = pad_total * (jnp.dtype(inp.dtype).itemsize
                            + jnp.dtype(target.dtype).itemsize)
    cost = pl.CostEstimate(
        flops=5 * total,
        transcendentals=0,
        bytes_accessed=bytes_in + num_tiles * 8 * _LANE * 4,
    )

    partials = pl.pallas_call(
        kernel,
        out_shape=jax.ShapeDtypeStruct((num_tiles * 8, _LANE), jnp.float32),
        grid_spec=pltpu.PrefetchScalarGridSpec(
            num_scalar_prefetch=0,
            grid=(num_tiles,),
            in_specs=[
                pl.BlockSpec((tile_rows, _LANE), lambda i: (i, 0)),
                pl.BlockSpec((tile_rows, _LANE), lambda i: (i, 0)),
            ],
            out_specs=pl.BlockSpec((8, _LANE), lambda i: (i, 0)),
        ),
        compiler_params=pltpu.CompilerParams(
            # Independent output blocks -> grid axis shardable across v7x TCs.
            dimension_semantics=("parallel",),
            vmem_limit_bytes=32 * 1024 * 1024,
        ),
        cost_estimate=cost,
    )(x, t)

    # One cross-lane reduce over the tiny partials array; divisor uses the true
    # (unpadded) element count, computed in Python double precision.
    return (jnp.sum(partials) * jnp.float32(1.0 / total)).astype(jnp.float32)


if __name__ == "__main__":
    key = jax.random.PRNGKey(0)
    k1, k2, k3 = jax.random.split(key, 3)

    N, C, H, W = 2, 4, 16, 16
    ignore_index = -1.0

    inp = jax.random.normal(k1, (N, C, H, W), dtype=jnp.float32)
    tgt = jax.random.normal(k2, (N, C, H, W), dtype=jnp.float32)
    # Inject ignore_index into ~25% of the target so masking is exercised.
    drop = jax.random.bernoulli(k3, 0.25, tgt.shape)
    tgt = jnp.where(drop, jnp.float32(ignore_index), tgt)

    out = jax.block_until_ready(masked_mse_loss(inp, tgt, ignore_index))

    # Pure-JAX reference of the wrapper semantics.
    m = (tgt != ignore_index).astype(jnp.float32)
    ref = jnp.mean((inp * m - tgt * m) ** 2)
    assert jnp.allclose(out, ref, rtol=1e-5, atol=1e-6), (out, ref)

    # Secondary check: total not a multiple of 1024 (small-pad path) AND a
    # ragged last grid tile (in-kernel row masking path).
    shp2 = (2, 5, 9, 31)                      # 2790 elems -> pad to 3072, rows=24
    k4, k5, k6 = jax.random.split(jax.random.PRNGKey(1), 3)
    inp2 = jax.random.normal(k4, shp2, dtype=jnp.float32)
    tgt2 = jax.random.normal(k5, shp2, dtype=jnp.float32)
    tgt2 = jnp.where(jax.random.bernoulli(k6, 0.25, shp2),
                     jnp.float32(ignore_index), tgt2)
    out2 = jax.block_until_ready(
        masked_mse_loss(inp2, tgt2, ignore_index, max_tile_rows=16))
    m2 = (tgt2 != ignore_index).astype(jnp.float32)
    ref2 = jnp.mean((inp2 * m2 - tgt2 * m2) ** 2)
    assert jnp.allclose(out2, ref2, rtol=1e-5, atol=1e-6), (out2, ref2)

    print("KERNEL_OK")
</pallas_src>

<mosaic_0001>
module attributes {stable_mosaic.version = 11 : i64} {
  func.func @_masked_mse_partial_kernel(%arg0: i32, %arg1: memref<16x128xf32, #tpu.memory_space<vmem>>, %arg2: memref<16x128xf32, #tpu.memory_space<vmem>>, %arg3: memref<8x128xf32, #tpu.memory_space<vmem>>) attributes {dimension_semantics = [#tpu.dimension_semantics<parallel>], iteration_bounds = array<i64: 1>, scalar_prefetch = 0 : i64, scratch_operands = 0 : i64, tpu.core_type = #tpu.core_type<tc>, window_params = [{transform_indices = @transform_0, window_bounds = array<i64: 16, 128>}, {transform_indices = @transform_1, window_bounds = array<i64: 16, 128>}, {transform_indices = @transform_2, window_bounds = array<i64: 8, 128>}]} {
    %c0 = arith.constant 0 : index
    %c0_0 = arith.constant 0 : index
    %0 = vector.load %arg2[%c0, %c0_0] : memref<16x128xf32, #tpu.memory_space<vmem>>, vector<16x128xf32>
    %cst = arith.constant -1.000000e+00 : f32
    %1 = vector.broadcast %cst : f32 to vector<16x128xf32>
    %2 = arith.cmpf one, %0, %1 : vector<16x128xf32>
    %c0_1 = arith.constant 0 : index
    %c0_2 = arith.constant 0 : index
    %3 = vector.load %arg1[%c0_1, %c0_2] : memref<16x128xf32, #tpu.memory_space<vmem>>, vector<16x128xf32>
    %4 = arith.subf %3, %0 : vector<16x128xf32>
    %cst_3 = arith.constant 0.000000e+00 : f32
    %5 = vector.broadcast %cst_3 : f32 to vector<16x128xf32>
    %6 = arith.select %2, %4, %5 : vector<16x128xi1>, vector<16x128xf32>
    %7 = arith.mulf %6, %6 : vector<16x128xf32>
    %8 = vector.shape_cast %7 : vector<16x128xf32> to vector<2x8x128xf32>
    %cst_4 = arith.constant dense<0.000000e+00> : vector<8x128xf32>
    %9 = vector.multi_reduction <add>, %8, %cst_4 [0] : vector<2x8x128xf32> to vector<8x128xf32>
    %c0_5 = arith.constant 0 : index
    %c0_6 = arith.constant 0 : index
    %10 = vector.load %arg3[%c0_5, %c0_6] : memref<8x128xf32, #tpu.memory_space<vmem>>, vector<8x128xf32>
    tpu.vector_store %arg3[%c0_5, %c0_6], %9 {strides = array<i32>} : memref<8x128xf32, #tpu.memory_space<vmem>>, vector<8x128xf32>,
    return
  }
  func.func @transform_0(%arg0: i32) -> (i32, i32) {
    %c0_i32 = arith.constant 0 : i32
    %c0_i32_0 = arith.constant 0 : i32
    return %arg0, %c0_i32 : i32, i32
  }
  func.func @transform_1(%arg0: i32) -> (i32, i32) {
    %c0_i32 = arith.constant 0 : i32
    %c0_i32_0 = arith.constant 0 : i32
    return %arg0, %c0_i32 : i32, i32
  }
  func.func @transform_2(%arg0: i32) -> (i32, i32) {
    %c0_i32 = arith.constant 0 : i32
    %c0_i32_0 = arith.constant 0 : i32
    return %arg0, %c0_i32 : i32, i32
  }
}

</mosaic_0001>

<bundles_post_ra>
// kernel: tpu_custom_call.1
= control target key start
LH: loop header
LB: loop body
LE: loop exit
PB: predicated region body
PF: predicated region fallthrough
CT: control target
= control target key end

     0   :  { %7 = vsyncpa [#allocation3], 0  ;;  %s203_s0 = inlined_call_operand.hbm [shape: f32[16,128], index: 0, kind: input, shape index: {}]   ;;  %s204_s1 = inlined_call_operand.hbm [shape: f32[16,128], index: 1, kind: input, shape index: {}]   ;;  %s205_s2 = inlined_call_operand.hbm [shape: f32[8,128], index: 2, kind: output, shape index: {}]  }
   0x1   :  { %8 = vsyncpa [#allocation6], 0 }
   0x2   :  { %9 = vsyncpa [#allocation4], 0  ;;  %s147_s9 = smov [#allocation2]   ;;  %s75_s13 = scalar_lea.hbm %s203_s0, 256 }
   0x3   :  { %s15_s10 = sshll.u32 %s147_s9, 4  ;;  %p76_p0 = scmp.ne.s32.totalorder %s203_s0, %s75_s13  ;;  %s16_s10 = int_to_ptr.vmem [resolvable:$true] %s15_s10 }
   0x4   :  { %p79_p1 = scmp.lt.u32.totalorder %s75_s13, %s203_s0 }
   0x6   :  { %p81_p2 = pnand %p79_p1, %p76_p0 }
   0x8   :  { %84 = shalt.err (!%p81_p2)
}
   0x9   :  { %s85_s18 = scalar_lea.vmem %s16_s10, 256  ;;  %p90_p4 = scmp.lt.s32.totalorder %s16_s10, %s16_s10 }
   0xa   :  { %p86_p3 = scmp.ne.s32.totalorder %s16_s10, %s85_s18  ;;  %p91_p5 = scmp.lt.s32.totalorder %s85_s18, %s85_s18 }
   0xc   :  { %p92_p6 = por %p91_p5, %p90_p4 }
   0xe   :  { %p93_p7 = pnand %p92_p6, %p86_p3 }
  0x10   :  { %96 = shalt.err (!%p93_p7)
}
  0x11   :  { %s148_s19 = smov 128   ;;  %s149_s20 = smov 8  }
  0x12   :  { %21 = dma.hbm_to_vmem [thread:$0]  %s203_s0, 256, %s16_s10, [#allocation3], %s148_s19, %s148_s19, %s149_s20  }
  0x13   :  { %s150_s23 = smov [#allocation5]   ;;  %s97_s27 = scalar_lea.hbm %s204_s1, 256 }
  0x14   :  { %s27_s24 = sshll.u32 %s150_s23, 4  ;;  %p98_p8 = scmp.ne.s32.totalorder %s204_s1, %s97_s27  ;;  %s28_s24 = int_to_ptr.vmem [resolvable:$true] %s27_s24 }
  0x15   :  { %p101_p9 = scmp.lt.u32.totalorder %s97_s27, %s204_s1 }
  0x17   :  { %p103_p10 = pnand %p101_p9, %p98_p8 }
  0x19   :  { %106 = shalt.err (!%p103_p10)
}
  0x1a   :  { %s107_s4 = scalar_lea.vmem %s28_s24, 256  ;;  %p112_p12 = scmp.lt.s32.totalorder %s28_s24, %s28_s24 }
  0x1b   :  { %p108_p11 = scmp.ne.s32.totalorder %s28_s24, %s107_s4  ;;  %p113_p13 = scmp.lt.s32.totalorder %s107_s4, %s107_s4 }
  0x1d   :  { %p114_p0 = por %p113_p13, %p112_p12 }
  0x1f   :  { %p115_p1 = pnand %p114_p0, %p108_p11 }
  0x21   :  { %118 = shalt.err (!%p115_p1)
}
  0x22   :  { %33 = dma.hbm_to_vmem [thread:$0]  %s204_s1, 256, %s28_s24, [#allocation6], %s148_s19, %s148_s19, %s149_s20  }
  0x23   :  { %141 = dma.done.wait [#allocation3], 256  }
  0x24   :  { %142 = vsyncadd [#allocation3], 4294967040 }
  0x25   :  { %143 = dma.done.wait [#allocation6], 256  }
  0x26   :  { %144 = vsyncadd [#allocation6], 4294967040  ;;  %v40_v0 = vld [vmem:[#allocation5] sm:$0xff]  ;;  %v41_v1 = vld [vmem:[#allocation5 + $0x8] sm:$0xff]  ;;  %s151_s6 = smov [#allocation7]  }
  0x27   :  { %v44_v2 = vld [vmem:[#allocation2] sm:$0xff]  ;;  %vm42_vm0 = vcmp.ne.f32.partialorder %v40_v0, -1.0  ;;  %vm43_vm1 = vcmp.ne.f32.partialorder %v41_v1, -1.0  ;;  %v45_v3 = vld [vmem:[#allocation2 + $0x8] sm:$0xff]  ;;  %s60_s7 = sshll.u32 %s151_s6, 4  ;;  %s61_s7 = int_to_ptr.vmem [resolvable:$true] %s60_s7 }
  0x28   :  { %v46_v4 = vsub.f32 %v44_v2, %v40_v0  ;;  %v47_v5 = vsub.f32 %v45_v3, %v41_v1  ;;  %s119_s1 = scalar_lea.vmem %s61_s7, 128  ;;  %p124_p3 = scmp.lt.s32.totalorder %s61_s7, %s61_s7 }
  0x29   :  { %p120_p2 = scmp.ne.s32.totalorder %s61_s7, %s119_s1  ;;  %p125_p4 = scmp.lt.s32.totalorder %s119_s1, %s119_s1 }
  0x2a   :  { %v48_v6 = vsel %vm42_vm0, %v46_v4, 0.0  ;;  %v49_v7 = vsel %vm43_vm1, %v47_v5, 0.0 }
  0x2b   :  { %v50_v8 = vmul.f32 %v48_v6, %v48_v6  ;;  %v51_v9 = vmul.f32 %v49_v7, %v49_v7  ;;  %p126_p5 = por %p125_p4, %p124_p3 }
  0x2d   :  { %v52_v10 = vadd.f32 %v51_v9, %v50_v8  ;;  %p127_p6 = pnand %p126_p5, %p120_p2 }
  0x2f   :  { %53 = vst [vmem:[#allocation7] sm:$0xff] %v52_v10 }
  0x30   :  { %130 = shalt.err (!%p127_p6)
}
  0x31   :  { %s131_s10 = scalar_lea.hbm %s205_s2, 128 }
  0x32   :  { %p132_p7 = scmp.ne.s32.totalorder %s205_s2, %s131_s10  ;;  %p135_p8 = scmp.lt.u32.totalorder %s131_s10, %s205_s2 }
  0x34   :  { %p137_p9 = pnand %p135_p8, %p132_p7 }
  0x36   :  { %140 = shalt.err (!%p137_p9)
}
  0x37   :  { %63 = dma.vmem_to_hbm [thread:$0]  %s61_s7, 128, %s205_s2, [#allocation4]  }
  0x38   :  { %145 = dma.done.wait [#allocation4], 128  }
  0x39   :  { %146 = vsyncadd [#allocation4], 4294967168 }
  0x3a   :  { %67 = vsyncpa [#allocation3], 1 }
  0x3b   :  { %68 = vsyncpa [#allocation6], 1 }
  0x3c   :  { %69 = vsyncpa [#allocation4], 1 }

</bundles_post_ra>
